<compile_context>
chip_gen: v5e
topology: v5e:2x2
jax: 0.10.0
libtpu: 0.0.40
codegen_flags: <defaults>
</compile_context>

<pallas_src>
import functools

import jax
import jax.numpy as jnp
from jax import lax
from jax.experimental import pallas as pl
from jax.experimental.pallas import tpu as pltpu

NEG_SLOPE = 0.1     # nn.LeakyReLU(negative_slope=0.1)
BN_EPS = 1e-5       # nn.BatchNorm2d default eps


def _lrelu(x):
    return jnp.where(x >= 0, x, NEG_SLOPE * x)


# ---------------------------------------------------------------------------
# Pallas kernels
# ---------------------------------------------------------------------------

def _conv1_kernel(*refs, pre_act):
    # conv1 (im2col matmul) with optional fused bn1+lrelu on the patch operand
    # and fused bn2+lrelu epilogue.  K-tiled reduction on grid axis 1.
    if pre_act:
        p_ref, w_ref, s1_ref, b1_ref, s2_ref, b2_ref, o_ref, acc_ref = refs
    else:
        p_ref, w_ref, s2_ref, b2_ref, o_ref, acc_ref = refs

    k = pl.program_id(1)

    @pl.when(k == 0)
    def _():
        acc_ref[...] = jnp.zeros_like(acc_ref)

    if pre_act:
        # bn1 + LeakyReLU in f32 (v5e has no bf16 VPU), then bf16 for the MXU.
        y = p_ref[...].astype(jnp.float32) * s1_ref[...] + b1_ref[...]
        lhs = _lrelu(y).astype(jnp.bfloat16)
    else:
        lhs = p_ref[...]
    acc_ref[...] += jnp.dot(lhs, w_ref[...], preferred_element_type=jnp.float32)

    @pl.when(k == pl.num_programs(1) - 1)
    def _():
        y = acc_ref[...] * s2_ref[...] + b2_ref[...]
        o_ref[...] = _lrelu(y).astype(o_ref.dtype)


def _conv2_kernel(*refs, shortcut, pre_act):
    # conv2 (im2col matmul) + residual add.
    #   shortcut=False : identity residual, plain elementwise add (VPU).
    #   shortcut=True  : 1x1 shortcut conv (optionally with fused bn1+lrelu).
    if shortcut and pre_act:
        p_ref, w_ref, r_ref, wr_ref, s1_ref, b1_ref, o_ref, acc_ref = refs
    elif shortcut:
        p_ref, w_ref, r_ref, wr_ref, o_ref, acc_ref = refs
    else:
        p_ref, w_ref, r_ref, o_ref, acc_ref = refs

    k = pl.program_id(1)

    @pl.when(k == 0)
    def _():
        acc_ref[...] = jnp.zeros_like(acc_ref)

    acc_ref[...] += jnp.dot(p_ref[...], w_ref[...],
                            preferred_element_type=jnp.float32)

    @pl.when(k == pl.num_programs(1) - 1)
    def _():
        if shortcut:
            r = r_ref[...].astype(jnp.float32)
            if pre_act:
                r = _lrelu(r * s1_ref[...] + b1_ref[...])
            res = jnp.dot(r.astype(jnp.bfloat16), wr_ref[...],
                          preferred_element_type=jnp.float32)
        else:
            res = r_ref[...].astype(jnp.float32)   # identity: elementwise add
        o_ref[...] = (acc_ref[...] + res).astype(o_ref.dtype)


# ---------------------------------------------------------------------------
# Tiling helpers and pallas_call wrappers
# ---------------------------------------------------------------------------

def _round_up(x, m):
    return (x + m - 1) // m * m


def _choose_tile_m(m):
    """Row tile + padded M.  Prefer big tiles; pad M up instead of tiny tm."""
    if m <= 512:
        tm = _round_up(m, 8)
        return tm, tm
    for tm in (1024, 512, 256, 128):
        mp = _round_up(m, tm)
        if mp - m <= m // 8:            # accept <=12.5% padding waste
            return tm, mp
    return 128, _round_up(m, 128)


def _choose_tile_k(k):
    """Reduction tile: multiple of 128 dividing K if available, else full K."""
    if k % 128 == 0:
        for tk in (512, 384, 256, 128):
            if k % tk == 0:
                return tk
    return k


def conv1_fused(p, w_mat, s1p, b1p, s2, b2, *, pre_act,
                out_dtype=jnp.bfloat16):
    m, kdim = p.shape
    n = w_mat.shape[1]
    tm, mp = _choose_tile_m(m)
    tk = _choose_tile_k(kdim)
    if mp != m:
        p = jnp.pad(p, ((0, mp - m), (0, 0)))

    in_specs = [pl.BlockSpec((tm, tk), lambda i, k: (i, k)),
                pl.BlockSpec((tk, n), lambda i, k: (k, 0))]
    args = [p.astype(jnp.bfloat16), w_mat.astype(jnp.bfloat16)]
    if pre_act:
        in_specs += [pl.BlockSpec((1, tk), lambda i, k: (0, k)),
                     pl.BlockSpec((1, tk), lambda i, k: (0, k))]
        args += [s1p.reshape(1, kdim).astype(jnp.float32),
                 b1p.reshape(1, kdim).astype(jnp.float32)]
    in_specs += [pl.BlockSpec((1, n), lambda i, k: (0, 0)),
                 pl.BlockSpec((1, n), lambda i, k: (0, 0))]
    args += [s2.reshape(1, n).astype(jnp.float32),
             b2.reshape(1, n).astype(jnp.float32)]

    out = pl.pallas_call(
        functools.partial(_conv1_kernel, pre_act=pre_act),
        out_shape=jax.ShapeDtypeStruct((mp, n), out_dtype),
        grid=(mp // tm, kdim // tk),
        in_specs=in_specs,
        out_specs=pl.BlockSpec((tm, n), lambda i, k: (i, 0)),
        scratch_shapes=[pltpu.VMEM((tm, n), jnp.float32)],
        compiler_params=pltpu.CompilerParams(
            dimension_semantics=("parallel", "arbitrary")),
    )(*args)
    return out[:m]


def conv2_residual(p, w_mat, r, w_sc=None, s1=None, b1=None, *, pre_act=False,
                   out_dtype=jnp.float32):
    m, kdim = p.shape
    n = w_mat.shape[1]
    cr = r.shape[1]
    tm, mp = _choose_tile_m(m)
    tk = _choose_tile_k(kdim)
    if mp != m:
        p = jnp.pad(p, ((0, mp - m), (0, 0)))
        r = jnp.pad(r, ((0, mp - m), (0, 0)))
    shortcut = w_sc is not None

    in_specs = [pl.BlockSpec((tm, tk), lambda i, k: (i, k)),
                pl.BlockSpec((tk, n), lambda i, k: (k, 0)),
                pl.BlockSpec((tm, cr), lambda i, k: (i, 0))]
    args = [p.astype(jnp.bfloat16), w_mat.astype(jnp.bfloat16),
            r.astype(jnp.float32)]
    if shortcut:
        in_specs.append(pl.BlockSpec((cr, n), lambda i, k: (0, 0)))
        args.append(w_sc.astype(jnp.bfloat16))
        if pre_act:
            in_specs += [pl.BlockSpec((1, cr), lambda i, k: (0, 0)),
                         pl.BlockSpec((1, cr), lambda i, k: (0, 0))]
            args += [s1.reshape(1, cr).astype(jnp.float32),
                     b1.reshape(1, cr).astype(jnp.float32)]

    out = pl.pallas_call(
        functools.partial(_conv2_kernel, shortcut=shortcut, pre_act=pre_act),
        out_shape=jax.ShapeDtypeStruct((mp, n), out_dtype),
        grid=(mp // tm, kdim // tk),
        in_specs=in_specs,
        out_specs=pl.BlockSpec((tm, n), lambda i, k: (i, 0)),
        scratch_shapes=[pltpu.VMEM((tm, n), jnp.float32)],
        compiler_params=pltpu.CompilerParams(
            dimension_semantics=("parallel", "arbitrary")),
    )(*args)
    return out[:m]


# ---------------------------------------------------------------------------
# Plain-JAX glue: BN folding, im2col, module forward
# ---------------------------------------------------------------------------

def fold_bn(bn):
    scale = bn["gamma"] / jnp.sqrt(bn["var"] + BN_EPS)
    bias = bn["beta"] - bn["mean"] * scale
    return scale, bias


def im2col(x_nhwc, k, stride, pad, pad_value=None):
    """im2col with feature order (di, dj, c); optional per-channel pad value."""
    n, h, w, c = x_nhwc.shape
    if pad > 0:
        if pad_value is None:
            xp = jnp.pad(x_nhwc, ((0, 0), (pad, pad), (pad, pad), (0, 0)))
        else:
            pv = pad_value.astype(x_nhwc.dtype)
            xp = jnp.broadcast_to(pv, (n, h + 2 * pad, w + 2 * pad, c))
            xp = xp.at[:, pad:pad + h, pad:pad + w, :].set(x_nhwc)
    else:
        xp = x_nhwc
    ho = (h + 2 * pad - k) // stride + 1
    wo = (w + 2 * pad - k) // stride + 1
    cols = []
    for di in range(k):
        for dj in range(k):
            cols.append(xp[:, di:di + stride * ho:stride,
                           dj:dj + stride * wo:stride, :])
    p = jnp.concatenate(cols, axis=-1)
    return p.reshape(n * ho * wo, k * k * c), (ho, wo)


def basic_block_forward(x_nchw, params, *, stride, activate_before_residual,
                        drop_rate=0.0):
    w1 = params["conv1_w"]            # [Cout, Cin, 3, 3]  (PyTorch layout)
    w2 = params["conv2_w"]            # [Cout, Cout, 3, 3]
    out_planes, in_planes = w1.shape[0], w1.shape[1]
    equal = in_planes == out_planes

    x = jnp.transpose(x_nchw, (0, 2, 3, 1)).astype(jnp.float32)   # NCHW -> NHWC
    n, h, w_, cin = x.shape

    s1, b1 = fold_bn(params["bn1"])
    s2, b2 = fold_bn(params["bn2"])

    # conv1 consumes relu1(bn1(x)) unless (not equal and not abr), where the
    # PyTorch code computes the activation but feeds raw x to conv1.
    pre_act1 = equal or activate_before_residual

    # bf16 im2col of the *raw* x.  With the fused pre-activation, pad with
    # -bias/scale per channel so scale*pad+bias ~= 0 -> lrelu ~= 0, matching
    # zero padding of the activated tensor.  (Degenerate scale==0 guarded.)
    if pre_act1:
        safe_s1 = jnp.where(jnp.abs(s1) < 1e-12, 1.0, s1)
        pad_value = -b1 / safe_s1
    else:
        pad_value = None
    p1, (ho, wo) = im2col(x.astype(jnp.bfloat16), k=3, stride=stride, pad=1,
                          pad_value=pad_value)

    w1_mat = jnp.transpose(w1, (2, 3, 1, 0)).reshape(9 * in_planes, out_planes)
    s1p = jnp.tile(s1, 9)             # matches (di, dj, c) patch feature order
    b1p = jnp.tile(b1, 9)
    out = conv1_fused(p1, w1_mat, s1p, b1p, s2, b2, pre_act=pre_act1)  # bf16

    # TODO(synk): dropout (dropRate > 0) not implemented; module default is 0.0.

    # conv2 (3x3, stride 1, pad 1) fused with the residual add.
    w2_mat = jnp.transpose(w2, (2, 3, 1, 0)).reshape(9 * out_planes, out_planes)
    p2, _ = im2col(out.reshape(n, ho, wo, out_planes), k=3, stride=1, pad=1)

    if equal:
        # identity shortcut: plain f32 elementwise add in-kernel (no eye matmul)
        res = x.reshape(n * h * w_, out_planes)
        y = conv2_residual(p2, w2_mat, res)
    else:
        w_sc = params["conv_sc_w"]                          # [Cout, Cin, 1, 1]
        w_sc_mat = jnp.transpose(w_sc, (2, 3, 1, 0)).reshape(in_planes,
                                                             out_planes)
        res = x[:, ::stride, ::stride, :].reshape(n * ho * wo, in_planes)
        y = conv2_residual(p2, w2_mat, res, w_sc_mat, s1, b1,
                           pre_act=activate_before_residual)
    y = y.reshape(n, ho, wo, out_planes)
    return jnp.transpose(y, (0, 3, 1, 2))                   # NHWC -> NCHW


# ---------------------------------------------------------------------------
# Pure-JAX reference (correctness sanity check, full f32)
# ---------------------------------------------------------------------------

def ref_forward(x_nchw, params, *, stride, activate_before_residual):
    def bn(x, p):
        s, b = fold_bn(p)
        return x * s + b

    def conv(x, w, st, pad):
        return lax.conv_general_dilated(
            x, jnp.transpose(w, (2, 3, 1, 0)),
            window_strides=(st, st), padding=[(pad, pad), (pad, pad)],
            dimension_numbers=("NHWC", "HWIO", "NHWC"),
            precision=lax.Precision.HIGHEST)

    w1, w2 = params["conv1_w"], params["conv2_w"]
    equal = w1.shape[0] == w1.shape[1]
    x = jnp.transpose(x_nchw, (0, 2, 3, 1)).astype(jnp.float32)
    if (not equal) and activate_before_residual:
        x = _lrelu(bn(x, params["bn1"]))
        out = x
    else:
        out = _lrelu(bn(x, params["bn1"]))
    out = _lrelu(bn(conv(out if equal else x, w1, stride, 1), params["bn2"]))
    out = conv(out, w2, 1, 1)
    res = x if equal else conv(x, params["conv_sc_w"], stride, 0)
    return jnp.transpose(res + out, (0, 3, 1, 2))


# ---------------------------------------------------------------------------
# Deterministic parameter initialization (shapes from the module __init__)
# ---------------------------------------------------------------------------

def init_params(key, in_planes, out_planes):
    ks = jax.random.split(key, 5)

    def bn_params(k, c):
        k1, k2, k3, k4 = jax.random.split(k, 4)
        return dict(
            gamma=jax.random.uniform(k1, (c,), jnp.float32, 0.5, 1.5),
            beta=jax.random.normal(k2, (c,), jnp.float32) * 0.1,
            mean=jax.random.normal(k3, (c,), jnp.float32) * 0.1,
            var=jax.random.uniform(k4, (c,), jnp.float32, 0.5, 1.5),
        )

    p = dict(
        bn1=bn_params(ks[0], in_planes),
        bn2=bn_params(ks[1], out_planes),
        conv1_w=jax.random.normal(ks[2], (out_planes, in_planes, 3, 3),
                                  jnp.float32) * (1.0 / (3.0 * in_planes ** 0.5)),
        conv2_w=jax.random.normal(ks[3], (out_planes, out_planes, 3, 3),
                                  jnp.float32) * (1.0 / (3.0 * out_planes ** 0.5)),
    )
    if in_planes != out_planes:
        p["conv_sc_w"] = jax.random.normal(
            ks[4], (out_planes, in_planes, 1, 1),
            jnp.float32) * (1.0 / in_planes ** 0.5)
    return p


if __name__ == "__main__":
    key = jax.random.PRNGKey(0)
    k_x1, k_p1, k_x2, k_p2, k_x3, k_p3 = jax.random.split(key, 6)

    cases = []
    # Case 1: channel-changing (1x1 shortcut), stride 2, activate_before_residual
    x1 = jax.random.normal(k_x1, (2, 4, 16, 16), jnp.float32)
    prm1 = init_params(k_p1, 4, 8)
    cases.append(("case1", x1, prm1, 2, True, (2, 8, 8, 8)))
    # Case 2: identity shortcut, stride 1
    x2 = jax.random.normal(k_x2, (2, 8, 16, 16), jnp.float32)
    prm2 = init_params(k_p2, 8, 8)
    cases.append(("case2", x2, prm2, 1, False, (2, 8, 16, 16)))
    # Case 3: channel-changing, activate_before_residual=False (raw-x conv1 path)
    x3 = jax.random.normal(k_x3, (2, 4, 16, 16), jnp.float32)
    prm3 = init_params(k_p3, 4, 8)
    cases.append(("case3", x3, prm3, 2, False, (2, 8, 8, 8)))

    for name, x, prm, stride, abr, want_shape in cases:
        y = basic_block_forward(x, prm, stride=stride,
                                activate_before_residual=abr)
        y_ref = ref_forward(x, prm, stride=stride,
                            activate_before_residual=abr)
        jax.block_until_ready(y)
        assert y.shape == want_shape, (name, y.shape)
        if not jnp.allclose(y, y_ref, atol=3e-2, rtol=3e-2):
            raise AssertionError(
                (name, float(jnp.max(jnp.abs(y - y_ref)))))
    print("KERNEL_OK")
</pallas_src>

<mosaic_0001>
module attributes {stable_mosaic.version = 11 : i64} {
  func.func @_conv1_kernel(%arg0: i32, %arg1: i32, %arg2: memref<128x36xbf16, #tpu.memory_space<vmem>>, %arg3: memref<36x8xbf16, #tpu.memory_space<vmem>>, %arg4: memref<1x36xf32, #tpu.memory_space<vmem>>, %arg5: memref<1x36xf32, #tpu.memory_space<vmem>>, %arg6: memref<1x8xf32, #tpu.memory_space<vmem>>, %arg7: memref<1x8xf32, #tpu.memory_space<vmem>>, %arg8: memref<128x8xbf16, #tpu.memory_space<vmem>>, %arg9: memref<128x8xf32, #tpu.memory_space<vmem>>) attributes {dimension_semantics = [#tpu.dimension_semantics<parallel>, #tpu.dimension_semantics<arbitrary>], iteration_bounds = array<i64: 1, 1>, scalar_prefetch = 0 : i64, scratch_operands = 1 : i64, tpu.core_type = #tpu.core_type<tc>, window_params = [{transform_indices = @transform_0, window_bounds = array<i64: 128, 36>}, {transform_indices = @transform_1, window_bounds = array<i64: 36, 8>}, {transform_indices = @transform_2, window_bounds = array<i64: 1, 36>}, {transform_indices = @transform_3, window_bounds = array<i64: 1, 36>}, {pipeline_mode = #tpu.pipeline_mode<synchronous>, transform_indices = @transform_4, window_bounds = array<i64: 1, 8>}, {pipeline_mode = #tpu.pipeline_mode<synchronous>, transform_indices = @transform_5, window_bounds = array<i64: 1, 8>}, {transform_indices = @transform_6, window_bounds = array<i64: 128, 8>}]} {
    %c0_i32 = arith.constant 0 : i32
    %0 = arith.cmpi eq, %arg1, %c0_i32 : i32
    %1 = arith.extui %0 : i1 to i32
    %c0_i32_0 = arith.constant 0 : i32
    %2 = arith.cmpi ne, %1, %c0_i32_0 : i32
    scf.if %2 {
      %cst_16 = arith.constant 0.000000e+00 : f32
      %25 = vector.broadcast %cst_16 : f32 to vector<128x8xf32>
      %c0_17 = arith.constant 0 : index
      %c0_18 = arith.constant 0 : index
      %26 = vector.load %arg9[%c0_17, %c0_18] : memref<128x8xf32, #tpu.memory_space<vmem>>, vector<128x8xf32>
      tpu.vector_store %arg9[%c0_17, %c0_18], %25 {strides = array<i32>} : memref<128x8xf32, #tpu.memory_space<vmem>>, vector<128x8xf32>,
    } else {
    }
    %c0 = arith.constant 0 : index
    %c0_1 = arith.constant 0 : index
    %3 = vector.load %arg2[%c0, %c0_1] : memref<128x36xbf16, #tpu.memory_space<vmem>>, vector<128x36xbf16>
    %4 = arith.extf %3 : vector<128x36xbf16> to vector<128x36xf32>
    %c0_2 = arith.constant 0 : index
    %c0_3 = arith.constant 0 : index
    %5 = vector.load %arg4[%c0_2, %c0_3] : memref<1x36xf32, #tpu.memory_space<vmem>>, vector<1x36xf32>
    %6 = vector.broadcast %5 : vector<1x36xf32> to vector<128x36xf32>
    %7 = arith.mulf %4, %6 : vector<128x36xf32>
    %c0_4 = arith.constant 0 : index
    %c0_5 = arith.constant 0 : index
    %8 = vector.load %arg5[%c0_4, %c0_5] : memref<1x36xf32, #tpu.memory_space<vmem>>, vector<1x36xf32>
    %9 = vector.broadcast %8 : vector<1x36xf32> to vector<128x36xf32>
    %10 = arith.addf %7, %9 : vector<128x36xf32>
    %cst = arith.constant 0.000000e+00 : f32
    %11 = vector.broadcast %cst : f32 to vector<128x36xf32>
    %12 = arith.cmpf oge, %10, %11 : vector<128x36xf32>
    %cst_6 = arith.constant 1.000000e-01 : f32
    %13 = vector.broadcast %cst_6 : f32 to vector<128x36xf32>
    %14 = arith.mulf %13, %10 : vector<128x36xf32>
    %15 = arith.select %12, %10, %14 : vector<128x36xi1>, vector<128x36xf32>
    %16 = arith.truncf %15 : vector<128x36xf32> to vector<128x36xbf16>
    %c0_7 = arith.constant 0 : index
    %c0_8 = arith.constant 0 : index
    %17 = vector.load %arg9[%c0_7, %c0_8] : memref<128x8xf32, #tpu.memory_space<vmem>>, vector<128x8xf32>
    %c0_9 = arith.constant 0 : index
    %c0_10 = arith.constant 0 : index
    %18 = vector.load %arg3[%c0_9, %c0_10] : memref<36x8xbf16, #tpu.memory_space<vmem>>, vector<36x8xbf16>
    %cst_11 = arith.constant dense<0.000000e+00> : vector<128x8xf32>
    %19 = tpu.matmul %16, %18, %cst_11 {dimension_numbers = #tpu.dot_dimension_numbers<[1], [0], [0], [1], [0, 0, 1, 1], [], []>} : vector<128x36xbf16>, vector<36x8xbf16>, vector<128x8xf32> -> vector<128x8xf32>
    %20 = arith.addf %17, %19 : vector<128x8xf32>
    %c0_12 = arith.constant 0 : index
    %c0_13 = arith.constant 0 : index
    %21 = vector.load %arg9[%c0_12, %c0_13] : memref<128x8xf32, #tpu.memory_space<vmem>>, vector<128x8xf32>
    tpu.vector_store %arg9[%c0_12, %c0_13], %20 {strides = array<i32>} : memref<128x8xf32, #tpu.memory_space<vmem>>, vector<128x8xf32>,
    %c0_i32_14 = arith.constant 0 : i32
    %22 = arith.cmpi eq, %arg1, %c0_i32_14 : i32
    %23 = arith.extui %22 : i1 to i32
    %c0_i32_15 = arith.constant 0 : i32
    %24 = arith.cmpi ne, %23, %c0_i32_15 : i32
    scf.if %24 {
      %c0_16 = arith.constant 0 : index
      %c0_17 = arith.constant 0 : index
      %25 = vector.load %arg9[%c0_16, %c0_17] : memref<128x8xf32, #tpu.memory_space<vmem>>, vector<128x8xf32>
      %c0_18 = arith.constant 0 : index
      %c0_19 = arith.constant 0 : index
      %26 = vector.load %arg6[%c0_18, %c0_19] : memref<1x8xf32, #tpu.memory_space<vmem>>, vector<1x8xf32>
      %27 = vector.broadcast %26 : vector<1x8xf32> to vector<128x8xf32>
      %28 = arith.mulf %25, %27 : vector<128x8xf32>
      %c0_20 = arith.constant 0 : index
      %c0_21 = arith.constant 0 : index
      %29 = vector.load %arg7[%c0_20, %c0_21] : memref<1x8xf32, #tpu.memory_space<vmem>>, vector<1x8xf32>
      %30 = vector.broadcast %29 : vector<1x8xf32> to vector<128x8xf32>
      %31 = arith.addf %28, %30 : vector<128x8xf32>
      %cst_22 = arith.constant 0.000000e+00 : f32
      %32 = vector.broadcast %cst_22 : f32 to vector<128x8xf32>
      %33 = arith.cmpf oge, %31, %32 : vector<128x8xf32>
      %cst_23 = arith.constant 1.000000e-01 : f32
      %34 = vector.broadcast %cst_23 : f32 to vector<128x8xf32>
      %35 = arith.mulf %34, %31 : vector<128x8xf32>
      %36 = arith.select %33, %31, %35 : vector<128x8xi1>, vector<128x8xf32>
      %37 = arith.truncf %36 : vector<128x8xf32> to vector<128x8xbf16>
      %c0_24 = arith.constant 0 : index
      %c0_25 = arith.constant 0 : index
      %38 = vector.load %arg8[%c0_24, %c0_25] : memref<128x8xbf16, #tpu.memory_space<vmem>>, vector<128x8xbf16>
      tpu.vector_store %arg8[%c0_24, %c0_25], %37 {strides = array<i32>} : memref<128x8xbf16, #tpu.memory_space<vmem>>, vector<128x8xbf16>,
    } else {
    }
    return
  }
  func.func @transform_0(%arg0: i32, %arg1: i32) -> (i32, i32) {
    %c0_i32 = arith.constant 0 : i32
    return %arg0, %arg1 : i32, i32
  }
  func.func @transform_1(%arg0: i32, %arg1: i32) -> (i32, i32) {
    %c0_i32 = arith.constant 0 : i32
    %c0_i32_0 = arith.constant 0 : i32
    return %arg1, %c0_i32 : i32, i32
  }
  func.func @transform_2(%arg0: i32, %arg1: i32) -> (i32, i32) {
    %c0_i32 = arith.constant 0 : i32
    %c0_i32_0 = arith.constant 0 : i32
    return %c0_i32, %arg1 : i32, i32
  }
  func.func @transform_3(%arg0: i32, %arg1: i32) -> (i32, i32) {
    %c0_i32 = arith.constant 0 : i32
    %c0_i32_0 = arith.constant 0 : i32
    return %c0_i32, %arg1 : i32, i32
  }
  func.func @transform_4(%arg0: i32, %arg1: i32) -> (i32, i32) {
    %c0_i32 = arith.constant 0 : i32
    %c0_i32_0 = arith.constant 0 : i32
    %c0_i32_1 = arith.constant 0 : i32
    return %c0_i32, %c0_i32_0 : i32, i32
  }
  func.func @transform_5(%arg0: i32, %arg1: i32) -> (i32, i32) {
    %c0_i32 = arith.constant 0 : i32
    %c0_i32_0 = arith.constant 0 : i32
    %c0_i32_1 = arith.constant 0 : i32
    return %c0_i32, %c0_i32_0 : i32, i32
  }
  func.func @transform_6(%arg0: i32, %arg1: i32) -> (i32, i32) {
    %c0_i32 = arith.constant 0 : i32
    %c0_i32_0 = arith.constant 0 : i32
    return %arg0, %c0_i32 : i32, i32
  }
}

</mosaic_0001>

<bundles_post_ra>
// kernel: tpu_custom_call.1
= control target key start
LH: loop header
LB: loop body
LE: loop exit
PB: predicated region body
PF: predicated region fallthrough
CT: control target
= control target key end

     0   :  { %vm234_vm0 = vcmask 1041408   ;;  %vm209_vm1 = vcmask 293888   ;;  %vm28_vm14 = vcmask 64512   ;;  %s794_s1 = inlined_call_operand.vmem [shape: bf16[36,8], index: 1, kind: input, shape index: {}]   ;;  %s795_s0 = inlined_call_operand.vmem [shape: bf16[128,36], index: 0, kind: input, shape index: {}]   ;;  %s796_s2 = inlined_call_operand.vmem [shape: f32[1,36], index: 2, kind: input, shape index: {}]   ;;  %s797_s3 = inlined_call_operand.vmem [shape: f32[1,36], index: 3, kind: input, shape index: {}]   ;;  %s798_s4 = inlined_call_operand.vmem [shape: f32[1,8], index: 4, kind: input, shape index: {}]   ;;  %s799_s5 = inlined_call_operand.vmem [shape: f32[1,8], index: 5, kind: input, shape index: {}]   ;;  %s800_s6 = inlined_call_operand.vmem [shape: bf16[128,8], index: 6, kind: output, shape index: {}]  }
   0x1   :  { %v193_v0 = vld [vmem:[%s794_s1 + $0x10] sm:$0x3]  ;;  %v483_v2 = vld [vmem:[%s795_s0] sm:$0xff]   ;;  %v514_v17 = vld [vmem:[%s795_s0 + $0x8] sm:$0xff]  }
   0x2   :  { %v203_v1 = vunpack.c.l.b16 %v193_v0  ;;  %v580_v3 = vld [vmem:[%s796_s2] ss:$0 sm:$0xff]  ;;  %v484_v4 = vunpack.c.l.bf16 %v483_v2  ;;  %v485_v5 = vunpack.c.h.bf16 %v483_v2  ;;  %v515_v7 = vld [vmem:[%s795_s0 + $0x10] sm:$0xff]   ;;  %v481_v22 = vld [vmem:[%s794_s1 + $0x8] sm:$0xff]  ;;  %v488_v30 = vunpack.c.l.bf16 %v514_v17 }
   0x3   :  { %v585_v6 = vld [vmem:[%s797_s3] ss:$0 sm:$0xff]  ;;  %v492_v9 = vunpack.c.l.bf16 %v515_v7  ;;  %v493_v10 = vunpack.c.h.bf16 %v515_v7  ;;  %v519_v12 = vld [vmem:[%s795_s0 + $0x30] sm:$0xff]   ;;  %v516_v31 = vld [vmem:[%s795_s0 + $0x18] sm:$0xff]   ;;  %v489_v40 = vunpack.c.h.bf16 %v514_v17 }
   0x4   :  { %v206_v8 = vpack.c.b16 %v203_v1, %v203_v1  ;;  %v517_v11 = vld [vmem:[%s795_s0 + $0x20] sm:$0xff]   ;;  %v81_v13 = vmul.f32 %v580_v3, %v484_v4  ;;  %v82_v14 = vmul.f32 %v580_v3, %v485_v5  ;;  %v508_v21 = vunpack.c.l.bf16 %v519_v12  ;;  %v518_v48 = vld [vmem:[%s795_s0 + $0x28] sm:$0xff]  }
   0x5   :  { %v500_v15 = vunpack.c.l.bf16 %v517_v11  ;;  %v501_v16 = vunpack.c.h.bf16 %v517_v11  ;;  %v85_v19 = vmul.f32 %v580_v3, %v492_v9  ;;  %v86_v20 = vmul.f32 %v580_v3, %v493_v10  ;;  %v480_v36 = vld [vmem:[%s794_s1] sm:$0xff] }
   0x6   :  { %v236_v18 = vsel %vm234_vm0, %v206_v8, 0  ;;  %v101_v23 = vadd.f32 %v585_v6, %v81_v13  ;;  %v102_v24 = vadd.f32 %v585_v6, %v82_v14  ;;  %v509_v26 = vunpack.c.h.bf16 %v519_v12  ;;  %v520_v13 = vld [vmem:[%s795_s0 + $0x38] sm:$0xff]  }
   0x7   :  { %243 = vmatpush.bf16.msra.mxu0 %v236_v18  ;;  %521 = vmatpush.bf16.msra.mxu1 %v236_v18  ;;  %v89_v25 = vmul.f32 %v580_v3, %v500_v15  ;;  %v105_v27 = vadd.f32 %v585_v6, %v85_v19  ;;  %v106_v28 = vadd.f32 %v585_v6, %v86_v20  ;;  %v496_v44 = vunpack.c.l.bf16 %v516_v31 }
   0x8   :  { %522 = vmatpush.bf16.msra.mxu2 %v236_v18  ;;  %523 = vmatpush.bf16.msra.mxu3 %v236_v18  ;;  %v90_v29 = vmul.f32 %v580_v3, %v501_v16  ;;  %vm117_vm2 = vcmp.ge.f32.partialorder %v101_v23, 0.0  ;;  %vm118_vm3 = vcmp.ge.f32.partialorder %v102_v24, 0.0  ;;  %v133_v32 = vmul.f32 0.1, %v101_v23 }
   0x9   :  { %v134_v33 = vmul.f32 0.1, %v102_v24  ;;  %vm121_vm4 = vcmp.ge.f32.partialorder %v105_v27, 0.0  ;;  %vm122_vm5 = vcmp.ge.f32.partialorder %v106_v28, 0.0  ;;  %v137_v34 = vmul.f32 0.1, %v105_v27 }
   0xa   :  { %v138_v35 = vmul.f32 0.1, %v106_v28  ;;  %v149_v37 = vsel %vm117_vm2, %v101_v23, %v133_v32  ;;  %v109_v39 = vadd.f32 %v585_v6, %v89_v25  ;;  %v110_v46 = vadd.f32 %v585_v6, %v90_v29 }
   0xb   :  { %244 = vmatpush.bf16.msra.mxu0 %v481_v22  ;;  %524 = vmatpush.bf16.msra.mxu1 %v481_v22  ;;  %v150_v38 = vsel %vm118_vm3, %v102_v24, %v134_v33  ;;  %v153_v42 = vsel %vm121_vm4, %v105_v27, %v137_v34  ;;  %v93_v49 = vmul.f32 %v580_v3, %v508_v21  ;;  %v497_v55 = vunpack.c.h.bf16 %v516_v31 }
   0xc   :  { %525 = vmatpush.bf16.msra.mxu2 %v481_v22  ;;  %526 = vmatpush.bf16.msra.mxu3 %v481_v22  ;;  %v165_v41 = vpack.c.bf16 %v150_v38, %v149_v37  ;;  %v154_v43 = vsel %vm122_vm5, %v106_v28, %v138_v35  ;;  %vm125_vm6 = vcmp.ge.f32.partialorder %v109_v39, 0.0  ;;  %v141_v47 = vmul.f32 0.1, %v109_v39 }
   0xd   :  { %v167_v45 = vpack.c.bf16 %v154_v43, %v153_v42  ;;  %v94_v50 = vmul.f32 %v580_v3, %v509_v26  ;;  %v83_v51 = vmul.f32 %v580_v3, %v488_v30  ;;  %v84_v52 = vmul.f32 %v580_v3, %v489_v40 }
   0xe   :  { %vm126_vm7 = vcmp.ge.f32.partialorder %v110_v46, 0.0  ;;  %v142_v53 = vmul.f32 0.1, %v110_v46  ;;  %v157_v54 = vsel %vm125_vm6, %v109_v39, %v141_v47  ;;  %v113_v56 = vadd.f32 %v585_v6, %v93_v49  ;;  %v677_v49 = vld [vmem:[%s798_s4] ss:$0 sm:$0xff] }
   0xf   :  { %245 = vmatpush.bf16.msra.mxu0 %v480_v36  ;;  %527 = vmatpush.bf16.msra.mxu1 %v480_v36  ;;  %v114_v57 = vadd.f32 %v585_v6, %v94_v50  ;;  %v103_v58 = vadd.f32 %v585_v6, %v83_v51  ;;  %v504_v59 = vunpack.c.l.bf16 %v518_v48  ;;  %v104_v61 = vadd.f32 %v585_v6, %v84_v52 }
  0x10   :  { %528 = vmatpush.bf16.msra.mxu2 %v480_v36  ;;  %529 = vmatpush.bf16.msra.mxu3 %v480_v36  ;;  %v158_v60 = vsel %vm126_vm7, %v110_v46, %v142_v53  ;;  %v87_v62 = vmul.f32 %v580_v3, %v496_v44  ;;  %v88_v63 = vmul.f32 %v580_v3, %v497_v55  ;;  %vm129_vm8 = vcmp.ge.f32.partialorder %v113_v56, 0.0  ;;  %v682_v53 = vld [vmem:[%s799_s5] ss:$0 sm:$0xff] }
  0x11   :  { %v169_v0 = vpack.c.bf16 %v158_v60, %v157_v54  ;;  %vm130_vm9 = vcmp.ge.f32.partialorder %v114_v57, 0.0  ;;  %v145_v1 = vmul.f32 0.1, %v113_v56  ;;  %v146_v2 = vmul.f32 0.1, %v114_v57 }
  0x12   :  { %472 = vmatmul.msk.bf16.vlgmr.msra.gmra.mxu0 %vm209_vm1, %v165_v41  ;;  %474 = vmatmul.msk.bf16.vlgmr.msra.gmra.mxu1 %vm209_vm1, %v167_v45  ;;  %v135_v5 = vmul.f32 0.1, %v103_v58  ;;  %v107_v7 = vadd.f32 %v585_v6, %v87_v62  ;;  %v108_v8 = vadd.f32 %v585_v6, %v88_v63  ;;  %v136_v10 = vmul.f32 0.1, %v104_v61 }
  0x13   :  { %476 = vmatmul.msk.bf16.vlgmr.msra.gmra.mxu2 %vm209_vm1, %v169_v0  ;;  %v161_v4 = vsel %vm129_vm8, %v113_v56, %v145_v1  ;;  %v162_v9 = vsel %vm130_vm9, %v114_v57, %v146_v2  ;;  %v505_v11 = vunpack.c.h.bf16 %v518_v48  ;;  %v91_v12 = vmul.f32 %v580_v3, %v504_v59 }
  0x14   :  { %v171_v14 = vpack.c.bf16 %v162_v9, %v161_v4  ;;  %vm119_vm10 = vcmp.ge.f32.partialorder %v103_v58, 0.0  ;;  %vm120_vm11 = vcmp.ge.f32.partialorder %v104_v61, 0.0  ;;  %vm123_vm12 = vcmp.ge.f32.partialorder %v107_v7, 0.0 }
  0x15   :  { %vm124_vm13 = vcmp.ge.f32.partialorder %v108_v8, 0.0  ;;  %v139_v15 = vmul.f32 0.1, %v107_v7  ;;  %v140_v16 = vmul.f32 0.1, %v108_v8  ;;  %v92_v17 = vmul.f32 %v580_v3, %v505_v11 }
  0x16   :  { %478 = vmatmul.msk.bf16.vlgmr.msra.gmra.mxu3 %vm209_vm1, %v171_v14  ;;  %v111_v18 = vadd.f32 %v585_v6, %v91_v12  ;;  %v512_v19 = vunpack.c.l.bf16 %v520_v13  ;;  %v513_v20 = vunpack.c.h.bf16 %v520_v13  ;;  %v151_v21 = vsel %vm119_vm10, %v103_v58, %v135_v5 }
  0x17   :  { %v152_v22 = vsel %vm120_vm11, %v104_v61, %v136_v10  ;;  %v112_v23 = vadd.f32 %v585_v6, %v92_v17  ;;  %v155_v24 = vsel %vm123_vm12, %v107_v7, %v139_v15  ;;  %v535_v27 = vmov 0.0  }
  0x18   :  { %vm127_vm15 = vcmp.ge.f32.partialorder %v111_v18, 0.0  ;;  %v143_v25 = vmul.f32 0.1, %v111_v18  ;;  %v95_v26 = vmul.f32 %v580_v3, %v512_v19  ;;  %29 = vst.msk [vmem:[#allocation2] sm:$0xff] %vm28_vm14, %v535_v27  ;;  %v156_v28 = vsel %vm124_vm13, %v108_v8, %v140_v16 }
  0x19   :  { %vm128_vm0 = vcmp.ge.f32.partialorder %v112_v23, 0.0  ;;  %v144_v29 = vmul.f32 0.1, %v112_v23  ;;  %v96_v30 = vmul.f32 %v580_v3, %v513_v20  ;;  %30 = vst.msk [vmem:[#allocation2 + $0x8] sm:$0xff] %vm28_vm14, %v535_v27  ;;  %v166_v35 = vpack.c.bf16 %v152_v22, %v151_v21 }
  0x1a   :  { %v115_v31 = vadd.f32 %v585_v6, %v95_v26  ;;  %31 = vst.msk [vmem:[#allocation2 + $0x10] sm:$0xff] %vm28_vm14, %v535_v27  ;;  %v159_v32 = vsel %vm127_vm15, %v111_v18, %v143_v25  ;;  %v168_v36 = vpack.c.bf16 %v156_v28, %v155_v24  ;;  %vm443_vm5 = vcmask 60416  }
  0x1b   :  { %v160_v33 = vsel %vm128_vm0, %v112_v23, %v144_v29  ;;  %v116_v34 = vadd.f32 %v585_v6, %v96_v30  ;;  %32 = vst.msk [vmem:[#allocation2 + $0x18] sm:$0xff] %vm28_vm14, %v535_v27 }
  0x1c   :  { %vm131_vm2 = vcmp.ge.f32.partialorder %v115_v31, 0.0  ;;  %v147_v37 = vmul.f32 0.1, %v115_v31  ;;  %33 = vst.msk [vmem:[#allocation2 + $0x20] sm:$0xff] %vm28_vm14, %v535_v27  ;;  %v170_v38 = vpack.c.bf16 %v160_v33, %v159_v32 }
  0x1d   :  { %vm132_vm3 = vcmp.ge.f32.partialorder %v116_v34, 0.0  ;;  %v148_v3 = vmul.f32 0.1, %v116_v34  ;;  %34 = vst.msk [vmem:[#allocation2 + $0x28] sm:$0xff] %vm28_vm14, %v535_v27 }
  0x1e   :  { %35 = vst.msk [vmem:[#allocation2 + $0x30] sm:$0xff] %vm28_vm14, %v535_v27  ;;  %v163_v39 = vsel %vm131_vm2, %v115_v31, %v147_v37 }
  0x1f   :  { %v164_v40 = vsel %vm132_vm3, %v116_v34, %v148_v3  ;;  %36 = vst.msk [vmem:[#allocation2 + $0x38] sm:$0xff] %vm28_vm14, %v535_v27  ;;  %v173_v41 = vld [vmem:[#allocation2] sm:$0xff] }
  0x20   :  { %37 = vst.msk [vmem:[#allocation2 + $0x40] sm:$0xff] %vm28_vm14, %v535_v27  ;;  %v172_v6 = vpack.c.bf16 %v164_v40, %v163_v39  ;;  %v174_v48 = vld [vmem:[#allocation2 + $0x8] sm:$0xff] }
  0x21   :  { %38 = vst.msk [vmem:[#allocation2 + $0x48] sm:$0xff] %vm28_vm14, %v535_v27  ;;  %v175_v7 = vld [vmem:[#allocation2 + $0x10] sm:$0xff] }
  0x22   :  { %473 = vmatmul.msk.bf16.gmra.mxu0 %vm209_vm1, %v166_v35  ;;  %475 = vmatmul.msk.bf16.gmra.mxu1 %vm209_vm1, %v168_v36  ;;  %39 = vst.msk [vmem:[#allocation2 + $0x50] sm:$0xff] %vm28_vm14, %v535_v27 }
  0x23   :  { %477 = vmatmul.msk.bf16.gmra.mxu2 %vm209_vm1, %v170_v38  ;;  %40 = vst.msk [vmem:[#allocation2 + $0x58] sm:$0xff] %vm28_vm14, %v535_v27  ;;  %v177_v42 = vld [vmem:[#allocation2 + $0x20] sm:$0xff] }
  0x24   :  { %41 = vst.msk [vmem:[#allocation2 + $0x60] sm:$0xff] %vm28_vm14, %v535_v27  ;;  %v178_v50 = vld [vmem:[#allocation2 + $0x28] sm:$0xff] }
  0x25   :  { %42 = vst.msk [vmem:[#allocation2 + $0x68] sm:$0xff] %vm28_vm14, %v535_v27  ;;  %v179_v13 = vld [vmem:[#allocation2 + $0x30] sm:$0xff] }
  0x26   :  { %479 = vmatmul.msk.bf16.gmra.mxu3 %vm209_vm1, %v172_v6  ;;  %43 = vst.msk [vmem:[#allocation2 + $0x70] sm:$0xff] %vm28_vm14, %v535_v27 }
  0x27   :  { %44 = vst.msk [vmem:[#allocation2 + $0x78] sm:$0xff] %vm28_vm14, %v535_v27  ;;  %v181_v47 = vld [vmem:[#allocation2 + $0x40] sm:$0xff] }
  0x28   :  { %v182_v4 = vld [vmem:[#allocation2 + $0x48] sm:$0xff] }
  0x29   :  { %v183_v35 = vld [vmem:[#allocation2 + $0x50] sm:$0xff] }
  0x2b   :  { %v185_v58 = vld [vmem:[#allocation2 + $0x60] sm:$0xff] }
  0x2c   :  { %v186_v17 = vld [vmem:[#allocation2 + $0x68] sm:$0xff] }
  0x8f   :  { %v247_v43 = vpop.f32.mrf.mxu0  ;;  %v257_v44 = vpop.f32.mrf.mxu1 }
  0x90   :  { %v287_v45 = vadd.f32 %v247_v43, %v173_v41  ;;  %v291_v46 = vadd.f32 %v257_v44, %v177_v42  ;;  %v187_v43 = vld [vmem:[#allocation2 + $0x70] sm:$0xff] }
  0x92   :  { %304 = vst.msk [vmem:[#allocation2] sm:$0xff] %vm28_vm14, %v287_v45 }
  0x93   :  { %308 = vst.msk [vmem:[#allocation2 + $0x20] sm:$0xff] %vm28_vm14, %v291_v46 }
  0x96   :  { %v267_v51 = vpop.f32.mrf.mxu2 }
  0x97   :  { %v249_v52 = vpop.f32.mrf.mxu0  ;;  %v295_v54 = vadd.f32 %v267_v51, %v181_v47  ;;  %v259_v56 = vpop.f32.mrf.mxu1  ;;  %v176_v47 = vld [vmem:[#allocation2 + $0x18] sm:$0xff] }
  0x98   :  { %v288_v55 = vadd.f32 %v249_v52, %v174_v48  ;;  %v292_v59 = vadd.f32 %v259_v56, %v178_v50 }
  0x99   :  { %v323_v57 = vld [vmem:[#allocation2] sm:$0xff]  ;;  %312 = vst.msk [vmem:[#allocation2 + $0x40] sm:$0xff] %vm28_vm14, %v295_v54  ;;  %v277_v63 = vpop.f32.mrf.mxu3  ;;  %v180_v54 = vld [vmem:[#allocation2 + $0x38] sm:$0xff] }
  0x9a   :  { %v343_v60 = vmul.f32 %v677_v49, %v323_v57  ;;  %v327_v61 = vld [vmem:[#allocation2 + $0x20] sm:$0xff]  ;;  %305 = vst.msk [vmem:[#allocation2 + $0x8] sm:$0xff] %vm28_vm14, %v288_v55  ;;  %v299_v1 = vadd.f32 %v277_v63, %v185_v58 }
  0x9b   :  { %v347_v62 = vmul.f32 %v677_v49, %v327_v61  ;;  %309 = vst.msk [vmem:[#allocation2 + $0x28] sm:$0xff] %vm28_vm14, %v292_v59 }
  0x9c   :  { %v363_v0 = vadd.f32 %v682_v53, %v343_v60  ;;  %316 = vst.msk [vmem:[#allocation2 + $0x60] sm:$0xff] %vm28_vm14, %v299_v1 }
  0x9d   :  { %v367_v2 = vadd.f32 %v682_v53, %v347_v62 }
  0x9e   :  { %vm379_vm1 = vcmp.ge.f32.partialorder %v363_v0, 0.0  ;;  %v395_v5 = vmul.f32 0.1, %v363_v0  ;;  %v269_v9 = vpop.f32.mrf.mxu2 }
  0x9f   :  { %vm383_vm4 = vcmp.ge.f32.partialorder %v367_v2, 0.0  ;;  %v399_v8 = vmul.f32 0.1, %v367_v2  ;;  %v296_v11 = vadd.f32 %v269_v9, %v182_v4  ;;  %v252_v12 = vpop.f32.mrf.mxu0  ;;  %v262_v19 = vpop.f32.mrf.mxu1 }
  0xa0   :  { %v411_v10 = vsel %vm379_vm1, %v363_v0, %v395_v5  ;;  %v331_v16 = vld [vmem:[#allocation2 + $0x40] sm:$0xff]  ;;  %v289_v18 = vadd.f32 %v252_v12, %v175_v7  ;;  %v293_v26 = vadd.f32 %v262_v19, %v179_v13  ;;  %v184_v0 = vld [vmem:[#allocation2 + $0x58] sm:$0xff] }
  0xa1   :  { %v427_v14 = vpack.c.bf16 %v411_v10, %v411_v10  ;;  %v415_v15 = vsel %vm383_vm4, %v367_v2, %v399_v8  ;;  %v351_v21 = vmul.f32 %v677_v49, %v331_v16  ;;  %v324_v22 = vld [vmem:[#allocation2 + $0x8] sm:$0xff]  ;;  %313 = vst.msk [vmem:[#allocation2 + $0x48] sm:$0xff] %vm28_vm14, %v296_v11  ;;  %v279_v25 = vpop.f32.mrf.mxu3 }
  0xa2   :  { %v431_v20 = vpack.c.bf16 %v415_v15, %v415_v15  ;;  %v344_v23 = vmul.f32 %v677_v49, %v324_v22  ;;  %v328_v24 = vld [vmem:[#allocation2 + $0x28] sm:$0xff]  ;;  %v300_v29 = vadd.f32 %v279_v25, %v186_v17  ;;  %306 = vst.msk [vmem:[#allocation2 + $0x10] sm:$0xff] %vm28_vm14, %v289_v18  ;;  %v188_v17 = vld [vmem:[#allocation2 + $0x78] sm:$0xff] }
  0xa3   :  { %444 = vst.msk [vmem:[%s800_s6] sm:$0xf] %vm443_vm5, %v427_v14  ;;  %v371_v27 = vadd.f32 %v682_v53, %v351_v21  ;;  %v348_v28 = vmul.f32 %v677_v49, %v328_v24  ;;  %v335_v30 = vld [vmem:[#allocation2 + $0x60] sm:$0xff] }
  0xa4   :  { %448 = vst.msk [vmem:[%s800_s6 + $0x10] sm:$0xf] %vm443_vm5, %v431_v20  ;;  %v364_v31 = vadd.f32 %v682_v53, %v344_v23  ;;  %v355_v33 = vmul.f32 %v677_v49, %v335_v30 }
  0xa5   :  { %vm387_vm6 = vcmp.ge.f32.partialorder %v371_v27, 0.0  ;;  %v403_v32 = vmul.f32 0.1, %v371_v27  ;;  %v368_v34 = vadd.f32 %v682_v53, %v348_v28  ;;  %317 = vst.msk [vmem:[#allocation2 + $0x68] sm:$0xff] %vm28_vm14, %v300_v29 }
  0xa6   :  { %vm380_vm7 = vcmp.ge.f32.partialorder %v364_v31, 0.0  ;;  %v396_v36 = vmul.f32 0.1, %v364_v31  ;;  %310 = vst.msk [vmem:[#allocation2 + $0x30] sm:$0xff] %vm28_vm14, %v293_v26  ;;  %v272_v37 = vpop.f32.mrf.mxu2  ;;  %v375_v38 = vadd.f32 %v682_v53, %v355_v33 }
  0xa7   :  { %v419_v3 = vsel %vm387_vm6, %v371_v27, %v403_v32  ;;  %vm384_vm8 = vcmp.ge.f32.partialorder %v368_v34, 0.0  ;;  %v400_v39 = vmul.f32 0.1, %v368_v34  ;;  %v297_v42 = vadd.f32 %v272_v37, %v183_v35  ;;  %v254_v48 = vpop.f32.mrf.mxu0  ;;  %v264_v55 = vpop.f32.mrf.mxu1 }
  0xa8   :  { %v435_v40 = vpack.c.bf16 %v419_v3, %v419_v3  ;;  %v412_v6 = vsel %vm380_vm7, %v364_v31, %v396_v36  ;;  %v332_v41 = vld [vmem:[#allocation2 + $0x48] sm:$0xff]  ;;  %vm391_vm9 = vcmp.ge.f32.partialorder %v375_v38, 0.0  ;;  %v407_v44 = vmul.f32 0.1, %v375_v38 }
  0xa9   :  { %v428_v45 = vpack.c.bf16 %v412_v6, %v412_v6  ;;  %v416_v46 = vsel %vm384_vm8, %v368_v34, %v400_v39  ;;  %v352_v51 = vmul.f32 %v677_v49, %v332_v41  ;;  %v282_v52 = vpop.f32.mrf.mxu3  ;;  %v325_v57 = vld [vmem:[#allocation2 + $0x10] sm:$0xff]  ;;  %v290_v63 = vadd.f32 %v254_v48, %v176_v47  ;;  %314 = vst.msk [vmem:[#allocation2 + $0x50] sm:$0xff] %vm28_vm14, %v297_v42 }
  0xaa   :  { %452 = vst.msk [vmem:[%s800_s6 + $0x20] sm:$0xf] %vm443_vm5, %v435_v40  ;;  %v432_v50 = vpack.c.bf16 %v416_v46, %v416_v46  ;;  %v423_v56 = vsel %vm391_vm9, %v375_v38, %v407_v44  ;;  %v301_v58 = vadd.f32 %v282_v52, %v187_v43  ;;  %v345_v62 = vmul.f32 %v677_v49, %v325_v57 }
  0xab   :  { %445 = vst.msk [vmem:[%s800_s6 + $0x4] sm:$0xf] %vm443_vm5, %v428_v45  ;;  %v439_v59 = vpack.c.bf16 %v423_v56, %v423_v56  ;;  %v372_v60 = vadd.f32 %v682_v53, %v352_v51  ;;  %v294_v4 = vadd.f32 %v264_v55, %v180_v54 }
  0xac   :  { %449 = vst.msk [vmem:[%s800_s6 + $0x14] sm:$0xf] %vm443_vm5, %v432_v50  ;;  %v336_v61 = vld [vmem:[#allocation2 + $0x68] sm:$0xff]  ;;  %v365_v7 = vadd.f32 %v682_v53, %v345_v62 }
  0xad   :  { %v356_v1 = vmul.f32 %v677_v49, %v336_v61  ;;  %v329_v2 = vld [vmem:[#allocation2 + $0x30] sm:$0xff]  ;;  %456 = vst.msk [vmem:[%s800_s6 + $0x30] sm:$0xf] %vm443_vm5, %v439_v59  ;;  %vm388_vm10 = vcmp.ge.f32.partialorder %v372_v60, 0.0  ;;  %v404_v5 = vmul.f32 0.1, %v372_v60 }
  0xae   :  { %v349_v8 = vmul.f32 %v677_v49, %v329_v2  ;;  %v274_v9 = vpop.f32.mrf.mxu2  ;;  %318 = vst.msk [vmem:[#allocation2 + $0x70] sm:$0xff] %vm28_vm14, %v301_v58  ;;  %vm381_vm11 = vcmp.ge.f32.partialorder %v365_v7, 0.0  ;;  %v397_v13 = vmul.f32 0.1, %v365_v7 }
  0xaf   :  { %v376_v10 = vadd.f32 %v682_v53, %v356_v1  ;;  %v298_v11 = vadd.f32 %v274_v9, %v184_v0  ;;  %v420_v12 = vsel %vm388_vm10, %v372_v60, %v404_v5  ;;  %307 = vst.msk [vmem:[#allocation2 + $0x18] sm:$0xff] %vm28_vm14, %v290_v63 }
  0xb0   :  { %v369_v14 = vadd.f32 %v682_v53, %v349_v8  ;;  %v436_v15 = vpack.c.bf16 %v420_v12, %v420_v12  ;;  %311 = vst.msk [vmem:[#allocation2 + $0x38] sm:$0xff] %vm28_vm14, %v294_v4  ;;  %v413_v18 = vsel %vm381_vm11, %v365_v7, %v397_v13  ;;  %v333_v25 = vld [vmem:[#allocation2 + $0x50] sm:$0xff] }
  0xb1   :  { %vm392_vm12 = vcmp.ge.f32.partialorder %v376_v10, 0.0  ;;  %v408_v16 = vmul.f32 0.1, %v376_v10  ;;  %315 = vst.msk [vmem:[#allocation2 + $0x58] sm:$0xff] %vm28_vm14, %v298_v11  ;;  %v284_v20 = vpop.f32.mrf.mxu3  ;;  %v429_v22 = vpack.c.bf16 %v413_v18, %v413_v18  ;;  %v353_v28 = vmul.f32 %v677_v49, %v333_v25 }
  0xb2   :  { %vm385_vm13 = vcmp.ge.f32.partialorder %v369_v14, 0.0  ;;  %v401_v19 = vmul.f32 0.1, %v369_v14  ;;  %453 = vst.msk [vmem:[%s800_s6 + $0x24] sm:$0xf] %vm443_vm5, %v436_v15  ;;  %v302_v26 = vadd.f32 %v284_v20, %v188_v17 }
  0xb3   :  { %v424_v21 = vsel %vm392_vm12, %v376_v10, %v408_v16  ;;  %446 = vst.msk [vmem:[%s800_s6 + $0x8] sm:$0xf] %vm443_vm5, %v429_v22  ;;  %v373_v30 = vadd.f32 %v682_v53, %v353_v28 }
  0xb4   :  { %v440_v23 = vpack.c.bf16 %v424_v21, %v424_v21  ;;  %v417_v24 = vsel %vm385_vm13, %v369_v14, %v401_v19  ;;  %319 = vst.msk [vmem:[#allocation2 + $0x78] sm:$0xff] %vm28_vm14, %v302_v26 }
  0xb5   :  { %v433_v27 = vpack.c.bf16 %v417_v24, %v417_v24  ;;  %v337_v29 = vld [vmem:[#allocation2 + $0x70] sm:$0xff]  ;;  %vm389_vm15 = vcmp.ge.f32.partialorder %v373_v30, 0.0  ;;  %v405_v35 = vmul.f32 0.1, %v373_v30 }
  0xb6   :  { %457 = vst.msk [vmem:[%s800_s6 + $0x34] sm:$0xf] %vm443_vm5, %v440_v23  ;;  %v357_v31 = vmul.f32 %v677_v49, %v337_v29  ;;  %v326_v32 = vld [vmem:[#allocation2 + $0x18] sm:$0xff] }
  0xb7   :  { %450 = vst.msk [vmem:[%s800_s6 + $0x18] sm:$0xf] %vm443_vm5, %v433_v27  ;;  %v346_v33 = vmul.f32 %v677_v49, %v326_v32  ;;  %v330_v34 = vld [vmem:[#allocation2 + $0x38] sm:$0xff]  ;;  %v421_v40 = vsel %vm389_vm15, %v373_v30, %v405_v35 }
  0xb8   :  { %v377_v36 = vadd.f32 %v682_v53, %v357_v31  ;;  %v350_v37 = vmul.f32 %v677_v49, %v330_v34  ;;  %v334_v3 = vld [vmem:[#allocation2 + $0x58] sm:$0xff]  ;;  %v437_v42 = vpack.c.bf16 %v421_v40, %v421_v40 }
  0xb9   :  { %v366_v38 = vadd.f32 %v682_v53, %v346_v33  ;;  %v354_v39 = vmul.f32 %v677_v49, %v334_v3 }
  0xba   :  { %vm393_vm0 = vcmp.ge.f32.partialorder %v377_v36, 0.0  ;;  %v409_v6 = vmul.f32 0.1, %v377_v36  ;;  %v370_v41 = vadd.f32 %v682_v53, %v350_v37  ;;  %454 = vst.msk [vmem:[%s800_s6 + $0x28] sm:$0xf] %vm443_vm5, %v437_v42 }
  0xbb   :  { %vm382_vm2 = vcmp.ge.f32.partialorder %v366_v38, 0.0  ;;  %v398_v43 = vmul.f32 0.1, %v366_v38  ;;  %v374_v44 = vadd.f32 %v682_v53, %v354_v39  ;;  %v338_v54 = vld [vmem:[#allocation2 + $0x78] sm:$0xff] }
  0xbc   :  { %v425_v45 = vsel %vm393_vm0, %v377_v36, %v409_v6  ;;  %vm386_vm14 = vcmp.ge.f32.partialorder %v370_v41, 0.0  ;;  %v402_v46 = vmul.f32 0.1, %v370_v41  ;;  %v358_v57 = vmul.f32 %v677_v49, %v338_v54 }
  0xbd   :  { %v441_v47 = vpack.c.bf16 %v425_v45, %v425_v45  ;;  %v414_v48 = vsel %vm382_vm2, %v366_v38, %v398_v43  ;;  %vm390_vm3 = vcmp.ge.f32.partialorder %v374_v44, 0.0  ;;  %v406_v50 = vmul.f32 0.1, %v374_v44 }
  0xbe   :  { %v430_v51 = vpack.c.bf16 %v414_v48, %v414_v48  ;;  %v418_v52 = vsel %vm386_vm14, %v370_v41, %v402_v46  ;;  %v378_v59 = vadd.f32 %v682_v53, %v358_v57 }
  0xbf   :  { %458 = vst.msk [vmem:[%s800_s6 + $0x38] sm:$0xf] %vm443_vm5, %v441_v47  ;;  %v434_v55 = vpack.c.bf16 %v418_v52, %v418_v52  ;;  %v422_v56 = vsel %vm390_vm3, %v374_v44, %v406_v50 }
  0xc0   :  { %447 = vst.msk [vmem:[%s800_s6 + $0xc] sm:$0xf] %vm443_vm5, %v430_v51  ;;  %v438_v58 = vpack.c.bf16 %v422_v56, %v422_v56  ;;  %vm394_vm1 = vcmp.ge.f32.partialorder %v378_v59, 0.0  ;;  %v410_v49 = vmul.f32 0.1, %v378_v59 }
  0xc1   :  { %451 = vst.msk [vmem:[%s800_s6 + $0x1c] sm:$0xf] %vm443_vm5, %v434_v55 }
  0xc2   :  { %455 = vst.msk [vmem:[%s800_s6 + $0x2c] sm:$0xf] %vm443_vm5, %v438_v58  ;;  %v426_v60 = vsel %vm394_vm1, %v378_v59, %v410_v49 }
  0xc3   :  { %v442_v61 = vpack.c.bf16 %v426_v60, %v426_v60 }
  0xc5   :  { %459 = vst.msk [vmem:[%s800_s6 + $0x3c] sm:$0xf] %vm443_vm5, %v442_v61 }

</bundles_post_ra>
